<compile_context>
chip_gen: v7x
topology: tpu7x:2x2x1
jax: 0.10.0
libtpu: 0.0.40
codegen_flags: <defaults>
</compile_context>

<pallas_src>
import functools

import jax
import jax.numpy as jnp
import numpy as np
from jax.experimental import pallas as pl
from jax.experimental.pallas import tpu as pltpu

ST_SEP = 1.5          # module-level constant used by forward (as in the PyTorch code)
PAD_FACTOR = 10       # x is zero-padded to 10x its length
EPS = 1e-6
_LANE = 128


def _kernel(x_ref, cos_ref, nsin_ref, t_ref, amp_ref, xs_ref, xt_ref):
    """One (channel-tile j, k-tile k) grid step.

    x_ref   : (L, ct)   f32   input slab (constant along the k axis)
    cos_ref : (kt, L)   bf16  cos(2*pi*k*n/N) rows for this k tile (0 beyond K)
    nsin_ref: (kt, L)   bf16  -sin(...) rows for this k tile
    t_ref   : (L, L)    bf16  low-pass projection T (= irfft_low . rfft)
    amp_ref : (kt, ct)  bf16
    xs_ref  : (L, ct)   bf16  (written on k == 0 only)
    xt_ref  : (L, ct)   bf16  (written on k == 0 only)
    """
    xb = x_ref[...].astype(jnp.bfloat16)          # one load; bf16 copy for both matmuls

    # Forward real DFT for this k tile: bf16 x bf16 -> f32 accumulate, one MXU pass.
    re = jnp.dot(cos_ref[...], xb, preferred_element_type=jnp.float32)   # (kt, ct)
    im = jnp.dot(nsin_ref[...], xb, preferred_element_type=jnp.float32)  # (kt, ct)
    amp_ref[...] = jnp.sqrt((re + EPS) ** 2 + (im + EPS) ** 2).astype(amp_ref.dtype)

    # x_t / x_s do not depend on the k tile: do them once, on the first k step.
    @pl.when(pl.program_id(1) == 0)
    def _():
        xt = jnp.dot(t_ref[...], xb, preferred_element_type=jnp.float32)  # (L, ct)
        xt_ref[...] = xt.astype(xt_ref.dtype)
        # Re-read x from the (already VMEM-resident) block instead of keeping the
        # f32 value live across both matmuls.
        xs_ref[...] = (x_ref[...] - xt).astype(xs_ref.dtype)


@functools.lru_cache(maxsize=8)
def _build_bases(L, sep):
    """Cached bf16 DFT bases: forward cos / -sin (kp, L) and low-pass T (L, L)."""
    N = PAD_FACTOR * L
    K = N // 2 + 1
    kp = -(-K // 8) * 8                      # K padded up to a multiple of 8
    sep_eff = max(1, min(sep, K))

    n = np.arange(L, dtype=np.float64)
    k = np.arange(kp, dtype=np.float64)
    ang = 2.0 * np.pi * np.outer(k, n) / N                   # (kp, L)
    valid = (k < K)[:, None]
    cos = np.where(valid, np.cos(ang), 0.0)
    nsin = np.where(valid, -np.sin(ang), 0.0)

    # Low-pass projection, composed in f64 and quantized once to bf16:
    #   xt[n] = sum_{q<sep} w_q [cos(th_qn) Re_q - sin(th_qn) Im_q]
    #         = sum_m x[m] * sum_{q<sep} w_q cos(2*pi*q*(n-m)/N)  =  (T @ x)[n]
    # with irfft weights w_0 = 1/N, w_Nyq = 1/N, else 2/N.
    kk = np.arange(sep_eff, dtype=np.float64)
    w = np.full((sep_eff,), 2.0 / N)
    w[0] = 1.0 / N
    if sep_eff >= K:
        w[K - 1] = 1.0 / N                                    # Nyquist inside the band
    ang_l = 2.0 * np.pi * np.outer(n, kk) / N                 # (L, sep_eff)
    cl, sl = np.cos(ang_l), np.sin(ang_l)
    T = (cl * w) @ cl.T + (sl * w) @ sl.T                     # (L, L) symmetric Toeplitz

    return (jnp.asarray(cos, dtype=jnp.bfloat16),
            jnp.asarray(nsin, dtype=jnp.bfloat16),
            jnp.asarray(T, dtype=jnp.bfloat16),
            K, kp)


def _vmem_capacity_bytes():
    try:
        cap = getattr(pltpu.get_tpu_info(), "vmem_capacity_bytes", None)
        if cap:
            return int(cap)
    except Exception:
        pass
    return 64 * 2 ** 20       # conservative (v7x-sized) fallback


def _tile_plan(L, kp, bc_pad0, budget, vmem_cap, max_ct=None, max_kt=None):
    """Pick tiles: returns (ct, kt, n_ct, n_kt, bc_pad, kp_run)."""

    def fits(kt, ct):
        t_b = 2 * L * L                                  # T bf16, single buffer
        bas_b = 2 * 2 * (2 * kt * L)                     # cos + nsin bf16, 2 buffers
        x_b = 2 * (4 * L * ct)                           # x f32, 2 buffers
        out_b = 2 * (2 * kt * ct + 2 * 2 * L * ct)       # bf16 outputs, 2 buffers
        tmp_b = 4 * (2 * kt * ct + L * ct)               # f32 re/im/xt temporaries
        return t_b + bas_b + x_b + out_b + tmp_b <= budget

    kt_cap = kp if max_kt is None else max(8, min(kp, (max_kt // 8) * 8))

    cands = {128, 256, 512, 1024, 2048, min(bc_pad0, 4096)}
    if max_ct is not None:
        cands = {c for c in cands if c <= max_ct} or {128}
    cands = sorted((c for c in cands if c <= bc_pad0), reverse=True) or [128]

    ct, kt = 128, 8
    for c in cands:                                      # prefer the widest lane tile
        k = kt_cap
        while k > 8 and not fits(k, c):
            k = max(8, ((k // 2) + 7) // 8 * 8)
        if fits(k, c):
            ct, kt = c, k
            break
    # TODO(synk): for extreme L where even (128, 8) tiles overflow the budget the
    # (L, L) projection itself should be tiled; not reachable at realistic sizes.

    n_ct = -(-bc_pad0 // ct)
    # 64 MiB VMEM parts (v7x) have two TensorCores: give the "parallel" channel axis
    # at least two steps so both cores get work.  128 MiB parts keep the big tile.
    if vmem_cap <= 64 * 2 ** 20 and n_ct == 1 and ct >= 256:
        ct = -(-(ct // 2) // _LANE) * _LANE
        n_ct = -(-bc_pad0 // ct)

    n_kt = -(-kp // kt)
    return ct, kt, n_ct, n_kt, n_ct * ct, n_kt * kt


def fft_decomp_forward(x, st_sep=ST_SEP, out_dtype=jnp.float32,
                       *, _max_lane_tile=None, _max_k_tile=None):
    """x: (B, L, C) f32 -> (amp (B, K, C), x_s (B, L, C), x_t (B, L, C))."""
    B, L, C = x.shape
    sep = int(st_sep * 10)
    cosb, nsinb, tb, K, kp = _build_bases(L, sep)

    bc = B * C
    bc_pad0 = max(_LANE, -(-bc // _LANE) * _LANE)

    vmem_cap = _vmem_capacity_bytes()
    budget = int(min(max(vmem_cap * 0.85, 32 * 2 ** 20), 112 * 2 ** 20))
    ct, kt, n_ct, n_kt, bc_pad, kp_run = _tile_plan(
        L, kp, bc_pad0, budget, vmem_cap, _max_lane_tile, _max_k_tile)

    # Lane-dense slab: (batch*channel) on the lane axis, padded to the tiling.
    # TODO(synk): if producers/consumers can live in this (., B*C) slab layout (or
    # C % 128 == 0 so the kernel could emit (., B, C) blocks directly), these
    # transpose/pad HBM round trips disappear entirely.
    x2 = jnp.transpose(x, (1, 0, 2)).reshape(L, bc)
    if bc_pad != bc:
        x2 = jnp.pad(x2, ((0, 0), (0, bc_pad - bc)))

    if kp_run != kp:                      # pad basis rows to a whole number of k tiles
        cosb = jnp.pad(cosb, ((0, kp_run - kp), (0, 0)))
        nsinb = jnp.pad(nsinb, ((0, kp_run - kp), (0, 0)))

    def run(use_buffered):
        # Single-buffer the grid-invariant inputs (pure VMEM saving, same DMAs).
        const_kw = {"pipeline_mode": pl.Buffered(1)} if use_buffered else {}
        x_kw = const_kw if (use_buffered and n_ct == 1) else {}
        basis_kw = const_kw if (use_buffered and n_kt == 1) else {}
        return pl.pallas_call(
            _kernel,
            out_shape=(
                jax.ShapeDtypeStruct((kp_run, bc_pad), jnp.bfloat16),
                jax.ShapeDtypeStruct((L, bc_pad), jnp.bfloat16),
                jax.ShapeDtypeStruct((L, bc_pad), jnp.bfloat16),
            ),
            grid=(n_ct, n_kt),
            in_specs=[
                pl.BlockSpec((L, ct), lambda j, k: (0, j), **x_kw),       # x slab
                pl.BlockSpec((kt, L), lambda j, k: (k, 0), **basis_kw),   # cos rows
                pl.BlockSpec((kt, L), lambda j, k: (k, 0), **basis_kw),   # -sin rows
                pl.BlockSpec((L, L), lambda j, k: (0, 0), **const_kw),    # low-pass T
            ],
            out_specs=(
                pl.BlockSpec((kt, ct), lambda j, k: (k, j)),
                pl.BlockSpec((L, ct), lambda j, k: (0, j)),
                pl.BlockSpec((L, ct), lambda j, k: (0, j)),
            ),
            compiler_params=pltpu.CompilerParams(
                dimension_semantics=("parallel", "arbitrary"),
                vmem_limit_bytes=budget),
        )(x2, cosb, nsinb, tb)

    try:
        amp2, xs2, xt2 = run(True)
    except Exception:                      # pipeline_mode/Buffered(1) unsupported here
        amp2, xs2, xt2 = run(False)

    # Slice + reshape + transpose + cast fuse into one layout copy per output.
    amp = jnp.transpose(amp2[:K, :bc].reshape(K, B, C), (1, 0, 2)).astype(out_dtype)
    xs = jnp.transpose(xs2[:, :bc].reshape(L, B, C), (1, 0, 2)).astype(out_dtype)
    xt = jnp.transpose(xt2[:, :bc].reshape(L, B, C), (1, 0, 2)).astype(out_dtype)
    return amp, xs, xt


def _reference(x, st_sep=ST_SEP):
    """Pure-JAX reference mirroring the PyTorch forward exactly."""
    B, L, C = x.shape
    sep = int(st_sep * 10)
    x_pad = jnp.concatenate(
        [x, jnp.zeros((B, L * (PAD_FACTOR - 1), C), x.dtype)], axis=1)
    x_fft = jnp.fft.rfft(x_pad, axis=1)
    mask = (jnp.arange(x_fft.shape[1]) >= sep)[None, :, None]
    x_s = jnp.where(mask, x_fft, 0.0 + 0.0j)
    x_t = x_fft - x_s
    x_s_r = jnp.fft.irfft(x_s, axis=1)[:, :L, :].real.astype(jnp.float32)
    x_t_r = jnp.fft.irfft(x_t, axis=1)[:, :L, :].real.astype(jnp.float32)
    amp = jnp.sqrt((x_fft.real + EPS) ** 2 + (x_fft.imag + EPS) ** 2)
    return amp.astype(jnp.float32), x_s_r, x_t_r


if __name__ == "__main__":
    key = jax.random.PRNGKey(0)
    k1, k2 = jax.random.split(key)

    def check(xin, atol, **kw):
        # Tolerances sized for bf16 operand quantization (~2^-9 relative per
        # operand, error growing ~sqrt(L)) plus bf16 output rounding.
        outs = fft_decomp_forward(xin, **kw)
        jax.block_until_ready(outs)
        refs = _reference(xin)
        for got, ref in zip(outs, refs):
            np.testing.assert_allclose(np.asarray(got), np.asarray(ref),
                                       rtol=3e-2, atol=atol)
        return outs

    # Case 1: nominal small shape (single channel tile, single k step).
    x1 = jax.random.normal(k1, (2, 8, 32), dtype=jnp.float32)
    check(x1, atol=8e-2)

    # Case 2 (review concern): B*C > 512 and not a multiple of 128, larger L, with
    # forced small tiles so the multi-step channel pipeline, the k-axis tiling with
    # its pl.when(k==0) epilogue, lane padding and the odd-K amp slice are covered.
    x2 = jax.random.normal(k2, (5, 24, 130), dtype=jnp.float32)
    check(x2, atol=1.2e-1, _max_lane_tile=256, _max_k_tile=48)

    print("KERNEL_OK")
</pallas_src>

<mosaic_0001>
module attributes {stable_mosaic.version = 11 : i64} {
  func.func @_kernel(%arg0: i32, %arg1: i32, %arg2: memref<8x128xf32, #tpu.memory_space<vmem>>, %arg3: memref<48x8xbf16, #tpu.memory_space<vmem>>, %arg4: memref<48x8xbf16, #tpu.memory_space<vmem>>, %arg5: memref<8x8xbf16, #tpu.memory_space<vmem>>, %arg6: memref<48x128xbf16, #tpu.memory_space<vmem>>, %arg7: memref<8x128xbf16, #tpu.memory_space<vmem>>, %arg8: memref<8x128xbf16, #tpu.memory_space<vmem>>) attributes {dimension_semantics = [#tpu.dimension_semantics<parallel>, #tpu.dimension_semantics<arbitrary>], iteration_bounds = array<i64: 1, 1>, scalar_prefetch = 0 : i64, scratch_operands = 0 : i64, tpu.core_type = #tpu.core_type<tc>, window_params = [{pipeline_mode = #tpu.pipeline_mode<synchronous>, transform_indices = @transform_0, window_bounds = array<i64: 8, 128>}, {pipeline_mode = #tpu.pipeline_mode<synchronous>, transform_indices = @transform_1, window_bounds = array<i64: 48, 8>}, {pipeline_mode = #tpu.pipeline_mode<synchronous>, transform_indices = @transform_2, window_bounds = array<i64: 48, 8>}, {pipeline_mode = #tpu.pipeline_mode<synchronous>, transform_indices = @transform_3, window_bounds = array<i64: 8, 8>}, {transform_indices = @transform_4, window_bounds = array<i64: 48, 128>}, {transform_indices = @transform_5, window_bounds = array<i64: 8, 128>}, {transform_indices = @transform_6, window_bounds = array<i64: 8, 128>}]} {
    %c0 = arith.constant 0 : index
    %c0_0 = arith.constant 0 : index
    %0 = vector.load %arg2[%c0, %c0_0] : memref<8x128xf32, #tpu.memory_space<vmem>>, vector<8x128xf32>
    %1 = arith.truncf %0 : vector<8x128xf32> to vector<8x128xbf16>
    %c0_1 = arith.constant 0 : index
    %c0_2 = arith.constant 0 : index
    %2 = vector.load %arg3[%c0_1, %c0_2] : memref<48x8xbf16, #tpu.memory_space<vmem>>, vector<48x8xbf16>
    %cst = arith.constant dense<0.000000e+00> : vector<48x128xf32>
    %3 = tpu.matmul %2, %1, %cst {dimension_numbers = #tpu.dot_dimension_numbers<[1], [0], [0], [1], [0, 0, 1, 1], [], []>} : vector<48x8xbf16>, vector<8x128xbf16>, vector<48x128xf32> -> vector<48x128xf32>
    %c0_3 = arith.constant 0 : index
    %c0_4 = arith.constant 0 : index
    %4 = vector.load %arg4[%c0_3, %c0_4] : memref<48x8xbf16, #tpu.memory_space<vmem>>, vector<48x8xbf16>
    %cst_5 = arith.constant dense<0.000000e+00> : vector<48x128xf32>
    %5 = tpu.matmul %4, %1, %cst_5 {dimension_numbers = #tpu.dot_dimension_numbers<[1], [0], [0], [1], [0, 0, 1, 1], [], []>} : vector<48x8xbf16>, vector<8x128xbf16>, vector<48x128xf32> -> vector<48x128xf32>
    %cst_6 = arith.constant 9.99999997E-7 : f32
    %6 = vector.broadcast %cst_6 : f32 to vector<48x128xf32>
    %7 = arith.addf %3, %6 : vector<48x128xf32>
    %8 = arith.mulf %7, %7 : vector<48x128xf32>
    %cst_7 = arith.constant 9.99999997E-7 : f32
    %9 = vector.broadcast %cst_7 : f32 to vector<48x128xf32>
    %10 = arith.addf %5, %9 : vector<48x128xf32>
    %11 = arith.mulf %10, %10 : vector<48x128xf32>
    %12 = arith.addf %8, %11 : vector<48x128xf32>
    %13 = math.sqrt %12 : vector<48x128xf32>
    %14 = arith.truncf %13 : vector<48x128xf32> to vector<48x128xbf16>
    %c0_8 = arith.constant 0 : index
    %c0_9 = arith.constant 0 : index
    %15 = vector.load %arg6[%c0_8, %c0_9] : memref<48x128xbf16, #tpu.memory_space<vmem>>, vector<48x128xbf16>
    tpu.vector_store %arg6[%c0_8, %c0_9], %14 {strides = array<i32>} : memref<48x128xbf16, #tpu.memory_space<vmem>>, vector<48x128xbf16>,
    %c0_i32 = arith.constant 0 : i32
    %16 = arith.cmpi eq, %arg1, %c0_i32 : i32
    %17 = arith.extui %16 : i1 to i32
    %c0_i32_10 = arith.constant 0 : i32
    %18 = arith.cmpi ne, %17, %c0_i32_10 : i32
    scf.if %18 {
      %c0_11 = arith.constant 0 : index
      %c0_12 = arith.constant 0 : index
      %19 = vector.load %arg5[%c0_11, %c0_12] : memref<8x8xbf16, #tpu.memory_space<vmem>>, vector<8x8xbf16>
      %cst_13 = arith.constant dense<0.000000e+00> : vector<8x128xf32>
      %20 = tpu.matmul %19, %1, %cst_13 {dimension_numbers = #tpu.dot_dimension_numbers<[1], [0], [0], [1], [0, 0, 1, 1], [], []>} : vector<8x8xbf16>, vector<8x128xbf16>, vector<8x128xf32> -> vector<8x128xf32>
      %21 = arith.truncf %20 : vector<8x128xf32> to vector<8x128xbf16>
      %c0_14 = arith.constant 0 : index
      %c0_15 = arith.constant 0 : index
      %22 = vector.load %arg8[%c0_14, %c0_15] : memref<8x128xbf16, #tpu.memory_space<vmem>>, vector<8x128xbf16>
      tpu.vector_store %arg8[%c0_14, %c0_15], %21 {strides = array<i32>} : memref<8x128xbf16, #tpu.memory_space<vmem>>, vector<8x128xbf16>,
      %c0_16 = arith.constant 0 : index
      %c0_17 = arith.constant 0 : index
      %23 = vector.load %arg2[%c0_16, %c0_17] : memref<8x128xf32, #tpu.memory_space<vmem>>, vector<8x128xf32>
      %24 = arith.subf %23, %20 : vector<8x128xf32>
      %25 = arith.truncf %24 : vector<8x128xf32> to vector<8x128xbf16>
      %c0_18 = arith.constant 0 : index
      %c0_19 = arith.constant 0 : index
      %26 = vector.load %arg7[%c0_18, %c0_19] : memref<8x128xbf16, #tpu.memory_space<vmem>>, vector<8x128xbf16>
      tpu.vector_store %arg7[%c0_18, %c0_19], %25 {strides = array<i32>} : memref<8x128xbf16, #tpu.memory_space<vmem>>, vector<8x128xbf16>,
    } else {
    }
    return
  }
  func.func @transform_0(%arg0: i32, %arg1: i32) -> (i32, i32) {
    %c0_i32 = arith.constant 0 : i32
    %c0_i32_0 = arith.constant 0 : i32
    return %c0_i32, %arg0 : i32, i32
  }
  func.func @transform_1(%arg0: i32, %arg1: i32) -> (i32, i32) {
    %c0_i32 = arith.constant 0 : i32
    %c0_i32_0 = arith.constant 0 : i32
    return %arg1, %c0_i32 : i32, i32
  }
  func.func @transform_2(%arg0: i32, %arg1: i32) -> (i32, i32) {
    %c0_i32 = arith.constant 0 : i32
    %c0_i32_0 = arith.constant 0 : i32
    return %arg1, %c0_i32 : i32, i32
  }
  func.func @transform_3(%arg0: i32, %arg1: i32) -> (i32, i32) {
    %c0_i32 = arith.constant 0 : i32
    %c0_i32_0 = arith.constant 0 : i32
    %c0_i32_1 = arith.constant 0 : i32
    return %c0_i32, %c0_i32_0 : i32, i32
  }
  func.func @transform_4(%arg0: i32, %arg1: i32) -> (i32, i32) {
    %c0_i32 = arith.constant 0 : i32
    return %arg1, %arg0 : i32, i32
  }
  func.func @transform_5(%arg0: i32, %arg1: i32) -> (i32, i32) {
    %c0_i32 = arith.constant 0 : i32
    %c0_i32_0 = arith.constant 0 : i32
    return %c0_i32, %arg0 : i32, i32
  }
  func.func @transform_6(%arg0: i32, %arg1: i32) -> (i32, i32) {
    %c0_i32 = arith.constant 0 : i32
    %c0_i32_0 = arith.constant 0 : i32
    return %c0_i32, %arg0 : i32, i32
  }
}

module attributes {stable_mosaic.version = 11 : i64} {
  func.func @_kernel(%arg0: i32, %arg1: i32, %arg2: memref<8x128xf32, #tpu.memory_space<vmem>>, %arg3: memref<48x8xbf16, #tpu.memory_space<vmem>>, %arg4: memref<48x8xbf16, #tpu.memory_space<vmem>>, %arg5: memref<8x8xbf16, #tpu.memory_space<vmem>>, %arg6: memref<48x128xbf16, #tpu.memory_space<vmem>>, %arg7: memref<8x128xbf16, #tpu.memory_space<vmem>>, %arg8: memref<8x128xbf16, #tpu.memory_space<vmem>>) attributes {dimension_semantics = [#tpu.dimension_semantics<parallel>, #tpu.dimension_semantics<arbitrary>], iteration_bounds = array<i64: 1, 1>, scalar_prefetch = 0 : i64, scratch_operands = 0 : i64, tpu.core_type = #tpu.core_type<tc>, window_params = [{transform_indices = @transform_0, window_bounds = array<i64: 8, 128>}, {transform_indices = @transform_1, window_bounds = array<i64: 48, 8>}, {transform_indices = @transform_2, window_bounds = array<i64: 48, 8>}, {pipeline_mode = #tpu.pipeline_mode<synchronous>, transform_indices = @transform_3, window_bounds = array<i64: 8, 8>}, {transform_indices = @transform_4, window_bounds = array<i64: 48, 128>}, {transform_indices = @transform_5, window_bounds = array<i64: 8, 128>}, {transform_indices = @transform_6, window_bounds = array<i64: 8, 128>}]} {
    %c0 = arith.constant 0 : index
    %c0_0 = arith.constant 0 : index
    %0 = vector.load %arg2[%c0, %c0_0] : memref<8x128xf32, #tpu.memory_space<vmem>>, vector<8x128xf32>
    %1 = arith.truncf %0 : vector<8x128xf32> to vector<8x128xbf16>
    %c0_1 = arith.constant 0 : index
    %c0_2 = arith.constant 0 : index
    %2 = vector.load %arg3[%c0_1, %c0_2] : memref<48x8xbf16, #tpu.memory_space<vmem>>, vector<48x8xbf16>
    %cst = arith.constant dense<0.000000e+00> : vector<48x128xf32>
    %3 = tpu.matmul %2, %1, %cst {dimension_numbers = #tpu.dot_dimension_numbers<[1], [0], [0], [1], [0, 0, 1, 1], [], []>} : vector<48x8xbf16>, vector<8x128xbf16>, vector<48x128xf32> -> vector<48x128xf32>
    %c0_3 = arith.constant 0 : index
    %c0_4 = arith.constant 0 : index
    %4 = vector.load %arg4[%c0_3, %c0_4] : memref<48x8xbf16, #tpu.memory_space<vmem>>, vector<48x8xbf16>
    %cst_5 = arith.constant dense<0.000000e+00> : vector<48x128xf32>
    %5 = tpu.matmul %4, %1, %cst_5 {dimension_numbers = #tpu.dot_dimension_numbers<[1], [0], [0], [1], [0, 0, 1, 1], [], []>} : vector<48x8xbf16>, vector<8x128xbf16>, vector<48x128xf32> -> vector<48x128xf32>
    %cst_6 = arith.constant 9.99999997E-7 : f32
    %6 = vector.broadcast %cst_6 : f32 to vector<48x128xf32>
    %7 = arith.addf %3, %6 : vector<48x128xf32>
    %8 = arith.mulf %7, %7 : vector<48x128xf32>
    %cst_7 = arith.constant 9.99999997E-7 : f32
    %9 = vector.broadcast %cst_7 : f32 to vector<48x128xf32>
    %10 = arith.addf %5, %9 : vector<48x128xf32>
    %11 = arith.mulf %10, %10 : vector<48x128xf32>
    %12 = arith.addf %8, %11 : vector<48x128xf32>
    %13 = math.sqrt %12 : vector<48x128xf32>
    %14 = arith.truncf %13 : vector<48x128xf32> to vector<48x128xbf16>
    %c0_8 = arith.constant 0 : index
    %c0_9 = arith.constant 0 : index
    %15 = vector.load %arg6[%c0_8, %c0_9] : memref<48x128xbf16, #tpu.memory_space<vmem>>, vector<48x128xbf16>
    tpu.vector_store %arg6[%c0_8, %c0_9], %14 {strides = array<i32>} : memref<48x128xbf16, #tpu.memory_space<vmem>>, vector<48x128xbf16>,
    %c0_i32 = arith.constant 0 : i32
    %16 = arith.cmpi eq, %arg1, %c0_i32 : i32
    %17 = arith.extui %16 : i1 to i32
    %c0_i32_10 = arith.constant 0 : i32
    %18 = arith.cmpi ne, %17, %c0_i32_10 : i32
    scf.if %18 {
      %c0_11 = arith.constant 0 : index
      %c0_12 = arith.constant 0 : index
      %19 = vector.load %arg5[%c0_11, %c0_12] : memref<8x8xbf16, #tpu.memory_space<vmem>>, vector<8x8xbf16>
      %cst_13 = arith.constant dense<0.000000e+00> : vector<8x128xf32>
      %20 = tpu.matmul %19, %1, %cst_13 {dimension_numbers = #tpu.dot_dimension_numbers<[1], [0], [0], [1], [0, 0, 1, 1], [], []>} : vector<8x8xbf16>, vector<8x128xbf16>, vector<8x128xf32> -> vector<8x128xf32>
      %21 = arith.truncf %20 : vector<8x128xf32> to vector<8x128xbf16>
      %c0_14 = arith.constant 0 : index
      %c0_15 = arith.constant 0 : index
      %22 = vector.load %arg8[%c0_14, %c0_15] : memref<8x128xbf16, #tpu.memory_space<vmem>>, vector<8x128xbf16>
      tpu.vector_store %arg8[%c0_14, %c0_15], %21 {strides = array<i32>} : memref<8x128xbf16, #tpu.memory_space<vmem>>, vector<8x128xbf16>,
      %c0_16 = arith.constant 0 : index
      %c0_17 = arith.constant 0 : index
      %23 = vector.load %arg2[%c0_16, %c0_17] : memref<8x128xf32, #tpu.memory_space<vmem>>, vector<8x128xf32>
      %24 = arith.subf %23, %20 : vector<8x128xf32>
      %25 = arith.truncf %24 : vector<8x128xf32> to vector<8x128xbf16>
      %c0_18 = arith.constant 0 : index
      %c0_19 = arith.constant 0 : index
      %26 = vector.load %arg7[%c0_18, %c0_19] : memref<8x128xbf16, #tpu.memory_space<vmem>>, vector<8x128xbf16>
      tpu.vector_store %arg7[%c0_18, %c0_19], %25 {strides = array<i32>} : memref<8x128xbf16, #tpu.memory_space<vmem>>, vector<8x128xbf16>,
    } else {
    }
    return
  }
  func.func @transform_0(%arg0: i32, %arg1: i32) -> (i32, i32) {
    %c0_i32 = arith.constant 0 : i32
    %c0_i32_0 = arith.constant 0 : i32
    return %c0_i32, %arg0 : i32, i32
  }
  func.func @transform_1(%arg0: i32, %arg1: i32) -> (i32, i32) {
    %c0_i32 = arith.constant 0 : i32
    %c0_i32_0 = arith.constant 0 : i32
    return %arg1, %c0_i32 : i32, i32
  }
  func.func @transform_2(%arg0: i32, %arg1: i32) -> (i32, i32) {
    %c0_i32 = arith.constant 0 : i32
    %c0_i32_0 = arith.constant 0 : i32
    return %arg1, %c0_i32 : i32, i32
  }
  func.func @transform_3(%arg0: i32, %arg1: i32) -> (i32, i32) {
    %c0_i32 = arith.constant 0 : i32
    %c0_i32_0 = arith.constant 0 : i32
    %c0_i32_1 = arith.constant 0 : i32
    return %c0_i32, %c0_i32_0 : i32, i32
  }
  func.func @transform_4(%arg0: i32, %arg1: i32) -> (i32, i32) {
    %c0_i32 = arith.constant 0 : i32
    return %arg1, %arg0 : i32, i32
  }
  func.func @transform_5(%arg0: i32, %arg1: i32) -> (i32, i32) {
    %c0_i32 = arith.constant 0 : i32
    %c0_i32_0 = arith.constant 0 : i32
    return %c0_i32, %arg0 : i32, i32
  }
  func.func @transform_6(%arg0: i32, %arg1: i32) -> (i32, i32) {
    %c0_i32 = arith.constant 0 : i32
    %c0_i32_0 = arith.constant 0 : i32
    return %c0_i32, %arg0 : i32, i32
  }
}

</mosaic_0001>

<bundles_post_ra>
// kernel: tpu_custom_call.1
= control target key start
LH: loop header
LB: loop body
LE: loop exit
PB: predicated region body
PF: predicated region fallthrough
CT: control target
= control target key end

     0   :  { %12 = vsyncpa [#allocation3], 0  ;;  %vm62_vm0 = vcmask 1043456   ;;  %v572_v1 = vmov 0.0   ;;  %vm573_vm1 = vmmov 0   ;;  %vm52_vm2 = vcmask 64512   ;;  %s734_s0 = inlined_call_operand.vmem [shape: f32[8,128], index: 0, kind: input, shape index: {}]   ;;  %s735_s1 = inlined_call_operand.vmem [shape: bf16[48,8], index: 1, kind: input, shape index: {}]   ;;  %s736_s2 = inlined_call_operand.vmem [shape: bf16[48,8], index: 2, kind: input, shape index: {}]   ;;  %s737_s3 = inlined_call_operand.vmem [shape: bf16[8,8], index: 3, kind: input, shape index: {}]   ;;  %s738_s4 = inlined_call_operand.hbm [shape: bf16[48,128], index: 4, kind: output, shape index: {0}]   ;;  %s739_s5 = inlined_call_operand.hbm [shape: bf16[8,128], index: 5, kind: output, shape index: {1}]   ;;  %s740_s6 = inlined_call_operand.hbm [shape: bf16[8,128], index: 6, kind: output, shape index: {2}]  }
   0x1   :  { %v617_v0 = vld [vmem:[%s734_s0] sm:$0xff]  ;;  %443 = vmatprep.subr.bf16.mxu0 %v572_v1  ;;  %457 = vmatprep.subr.bf16.mxu1 %v572_v1 }
   0x2   :  { %v24_v2 = vpack.c.bf16 %v617_v0, %v617_v0  ;;  %445 = vmatprep.mubr.msk.bf16.mxu0 %vm573_vm1, %v572_v1  ;;  %459 = vmatprep.mubr.msk.bf16.mxu1 %vm573_vm1, %v572_v1  ;;  %v484_v3 = vld [vmem:[%s735_s1] sm:$0xff]  }
   0x3   :  { %v485_v5 = vld [vmem:[%s736_s2] sm:$0xff]  }
   0x4   :  { %v64_v4 = vsel %vm62_vm0, %v24_v2, 0 }
   0x5   :  { %444 = vmatpush3.bf16.msra.mxu0 %v64_v4  ;;  %458 = vmatpush3.bf16.msra.mxu1 %v64_v4 }
   0x6   :  { %471 = vmatprep.subr.bf16.mxu0 %v572_v1 }
   0x8   :  { %446 = vmatmul.mubr.msk.bf16.vlgmr.msra.gmra.mrb[0].mxu0 %vm52_vm2, %v484_v3  ;;  %460 = vmatmul.mubr.msk.bf16.vlgmr.msra.gmra.mrb[0].mxu1 %vm52_vm2, %v485_v5 }
   0x9   :  { %13 = vsyncpa [#allocation5], 0  ;;  %449 = vmatprep.mubr.msk.bf16.mxu0 %vm573_vm1, %v572_v1  ;;  %463 = vmatprep.mubr.msk.bf16.mxu1 %vm573_vm1, %v572_v1  ;;  %v486_v6 = vld [vmem:[%s735_s1 + $0x8] sm:$0xff]   ;;  %v488_v8 = vld [vmem:[%s735_s1 + $0x10] sm:$0xff]   ;;  %s574_s1 = smov [#allocation4]  }
   0xa   :  { %472 = vmatpush3.bf16.msra.mxu0 %v64_v4  ;;  %v487_v7 = vld [vmem:[%s736_s2 + $0x8] sm:$0xff]   ;;  %v489_v9 = vld [vmem:[%s736_s2 + $0x10] sm:$0xff]   ;;  %v298_v10 = vld [vmem:[%s737_s3] sm:$0xf]  ;;  %s366_s2 = sshll.u32 %s574_s1, 4  ;;  %s575_s3 = smov [#allocation6]   ;;  %s367_s2 = int_to_ptr.vmem [resolvable:$true] %s366_s2 }
   0xb   :  { %s376_s12 = sshll.u32 %s575_s3, 4  ;;  %s502_s13 = scalar_lea.vmem %s367_s2, 64  ;;  %s673_s12 = int_to_ptr.vmem [resolvable:$true] %s376_s12 }
   0xc   :  { %p503_p0 = scmp.ne.s32.totalorder %s367_s2, %s502_s13  ;;  %p507_p1 = scmp.lt.s32.totalorder %s367_s2, %s367_s2 }
   0xd   :  { %p508_p2 = scmp.lt.s32.totalorder %s502_s13, %s502_s13 }
   0xf   :  { %p509_p3 = por %p508_p2, %p507_p1 }
  0x10   :  { %450 = vmatmul.mubr.msk.bf16.gmra.mrb[4].mxu0 %vm52_vm2, %v486_v6  ;;  %464 = vmatmul.mubr.msk.bf16.gmra.mrb[4].mxu1 %vm52_vm2, %v487_v7 }
  0x11   :  { %453 = vmatprep.mubr.msk.bf16.mxu0 %vm573_vm1, %v572_v1  ;;  %467 = vmatprep.mubr.msk.bf16.mxu1 %vm573_vm1, %v572_v1  ;;  %p510_p4 = pnand %p509_p3, %p503_p0 }
  0x18   :  { %454 = vmatmul.mubr.msk.bf16.gmra.mrb[8].mxu0 %vm52_vm2, %v488_v8  ;;  %468 = vmatmul.mubr.msk.bf16.gmra.mrb[8].mxu1 %vm52_vm2, %v489_v9 }
  0x19   :  { %473 = vmatprep.mubr.msk.bf16.mxu0 %vm573_vm1, %v572_v1 }
  0x20   :  { %474 = vmatmul.mubr.msk.bf16.vlgmr.msra.gmra.mrb[12].mxu0 %vm52_vm2, %v298_v10 }
  0xdb   :  { %v100_v11 = vpop.f32.mrb[0].mxu0  ;;  %v187_v12 = vpop.f32.mrb[0].mxu1 }
  0xdc   :  { %v101_v13 = vadd.f32 1e-06, %v100_v11  ;;  %v188_v14 = vadd.f32 1e-06, %v187_v12  ;;  %v447_v15 = vpop.f32.mrb[1].mxu0  ;;  %v461_v16 = vpop.f32.mrb[1].mxu1 }
  0xdd   :  { %v103_v17 = vpop.f32.mrb[2].mxu0  ;;  %v190_v18 = vpop.f32.mrb[2].mxu1 }
  0xde   :  { %v123_v19 = vmul.f32 %v101_v13, %v101_v13  ;;  %v210_v20 = vmul.f32 %v188_v14, %v188_v14  ;;  %v104_v21 = vadd.f32 1e-06, %v103_v17  ;;  %v191_v22 = vadd.f32 1e-06, %v190_v18  ;;  %v448_v23 = vpop.f32.mrb[3].mxu0  ;;  %v462_v24 = vpop.f32.mrb[3].mxu1 }
  0xe0   :  { %v216_v25 = vadd.f32 %v210_v20, %v123_v19  ;;  %v124_v26 = vmul.f32 %v104_v21, %v104_v21  ;;  %v211_v27 = vmul.f32 %v191_v22, %v191_v22 }
  0xe2   :  { %490 = vrsqrt.f32 %v216_v25  ;;  %v217_v28 = vadd.f32 %v211_v27, %v124_v26  ;;  %vm224_vm3 = vcmp.eq.f32.partialorder %v216_v25, inf  ;;  %v227_v2 = vand.u32 2147483648, %v216_v25 }
  0xe3   :  { %v108_v29 = vpop.f32.mrb[4].mxu0  ;;  %v195_v30 = vpop.f32.mrb[4].mxu1  ;;  %vm226_vm5 = vcmp.eq.f32.partialorder %v216_v25, 0.0 }
  0xe4   :  { %492 = vrsqrt.f32 %v217_v28  ;;  %v109_v31 = vadd.f32 1e-06, %v108_v29  ;;  %v196_v32 = vadd.f32 1e-06, %v195_v30  ;;  %v451_v33 = vpop.f32.mrb[5].mxu0  ;;  %v465_v34 = vpop.f32.mrb[5].mxu1 }
  0xe5   :  { %v111_v35 = vpop.f32.mrb[6].mxu0  ;;  %v198_v36 = vpop.f32.mrb[6].mxu1  ;;  %vm231_vm4 = vcmp.eq.f32.partialorder %v217_v28, inf  ;;  %v234_v7 = vand.u32 2147483648, %v217_v28  ;;  %vm233_vm6 = vcmp.eq.f32.partialorder %v217_v28, 0.0 }
  0xe6   :  { %v125_v37 = vmul.f32 %v109_v31, %v109_v31  ;;  %v212_v38 = vmul.f32 %v196_v32, %v196_v32  ;;  %v112_v39 = vadd.f32 1e-06, %v111_v35  ;;  %v199_v40 = vadd.f32 1e-06, %v198_v36  ;;  %v452_v41 = vpop.f32.mrb[7].mxu0  ;;  %v466_v42 = vpop.f32.mrb[7].mxu1 }
  0xe8   :  { %v656_v43 = vadd.f32 %v212_v38, %v125_v37  ;;  %v126_v44 = vmul.f32 %v112_v39, %v112_v39  ;;  %v213_v45 = vmul.f32 %v199_v40, %v199_v40 }
  0xea   :  { %494 = vrsqrt.f32 %v656_v43  ;;  %v659_v46 = vadd.f32 %v213_v45, %v126_v44  ;;  %vm238_vm7 = vcmp.eq.f32.partialorder %v656_v43, inf }
  0xeb   :  { %v116_v47 = vpop.f32.mrb[8].mxu0  ;;  %v203_v48 = vpop.f32.mrb[8].mxu1 }
  0xec   :  { %v491_v49 = vpop.eup %490  ;;  %496 = vrsqrt.f32 %v659_v46  ;;  %v117_v50 = vadd.f32 1e-06, %v116_v47  ;;  %v204_v51 = vadd.f32 1e-06, %v203_v48  ;;  %v455_v52 = vpop.f32.mrb[9].mxu0  ;;  %vm245_vm8 = vcmp.eq.f32.partialorder %v659_v46, inf }
  0xed   :  { %v469_v53 = vpop.f32.mrb[9].mxu1  ;;  %v119_v54 = vpop.f32.mrb[10].mxu0  ;;  %v223_v56 = vmul.f32 %v491_v49, %v216_v25 }
  0xee   :  { %v206_v55 = vpop.f32.mrb[10].mxu1  ;;  %v493_v57 = vpop.eup %492  ;;  %v127_v58 = vmul.f32 %v117_v50, %v117_v50  ;;  %v214_v59 = vmul.f32 %v204_v51, %v204_v51  ;;  %v120_v60 = vadd.f32 1e-06, %v119_v54 }
  0xef   :  { %v207_v61 = vadd.f32 1e-06, %v206_v55  ;;  %v456_v62 = vpop.f32.mrb[11].mxu0  ;;  %v470_v63 = vpop.f32.mrb[11].mxu1  ;;  %v225_v1 = vsel %vm224_vm3, %v216_v25, %v223_v56  ;;  %v230_v3 = vmul.f32 %v493_v57, %v217_v28  ;;  %v248_v25 = vand.u32 2147483648, %v659_v46 }
  0xf0   :  { %v662_v4 = vadd.f32 %v214_v59, %v127_v58  ;;  %v128_v5 = vmul.f32 %v120_v60, %v120_v60  ;;  %v228_v10 = vsel %vm226_vm5, %v227_v2, %v225_v1 }
  0xf1   :  { %v215_v6 = vmul.f32 %v207_v61, %v207_v61  ;;  %v232_v8 = vsel %vm231_vm4, %v217_v28, %v230_v3 }
  0xf2   :  { %498 = vrsqrt.f32 %v662_v4  ;;  %v235_v11 = vsel %vm233_vm6, %v234_v7, %v232_v8 }
  0xf3   :  { %v665_v9 = vadd.f32 %v215_v6, %v128_v5  ;;  %v336_v12 = vpop.f32.mrb[12].mxu0  ;;  %v419_v13 = vpack.c.bf16 %v235_v11, %v228_v10 }
  0xf4   :  { %v495_v14 = vpop.eup %494  ;;  %v342_v15 = vpack.c.bf16 %v336_v12, %v336_v12  ;;  %v345_v16 = vsub.f32 %v617_v0, %v336_v12  ;;  %v475_v17 = vpop.f32.mrb[13].mxu0  ;;  %v241_v0 = vand.u32 2147483648, %v656_v43 }
  0xf5   :  { %500 = vrsqrt.f32 %v665_v9  ;;  %v339_v18 = vpop.f32.mrb[14].mxu0  ;;  %v237_v19 = vmul.f32 %v495_v14, %v656_v43  ;;  %420 = vst [vmem:[#allocation2] sm:$0xff] %v419_v13  }
  0xf6   :  { %v497_v20 = vpop.eup %496  ;;  %343 = vst [vmem:[#allocation6] sm:$0xf] %v342_v15  ;;  %v476_v21 = vpop.f32.mrb[15].mxu0  ;;  %v346_v22 = vpack.c.bf16 %v345_v16, %v345_v16 }
  0xf7   :  { %v239_v23 = vsel %vm238_vm7, %v656_v43, %v237_v19  ;;  %v244_v24 = vmul.f32 %v497_v20, %v659_v46 }
  0xf8   :  { %347 = vst [vmem:[#allocation4] sm:$0xf] %v346_v22 }
  0xf9   :  { %513 = shalt.err (!%p510_p4)
}
  0xfa   :  { %s514_s16 = scalar_lea.hbm %s739_s5, 64 }
  0xfb   :  { %p515_p5 = scmp.ne.s32.totalorder %s739_s5, %s514_s16  ;;  %p518_p6 = scmp.lt.u32.totalorder %s514_s16, %s739_s5 }
  0xfd   :  { %p520_p7 = pnand %p518_p6, %p515_p5 }
  0xff   :  { %523 = shalt.err (!%p520_p7)
}
 0x100   :  { %369 = dma.vmem_to_hbm [thread:$0]  %s367_s2, 64, %s739_s5, [#allocation5]   ;;  %vm240_vm9 = vcmp.eq.f32.partialorder %v656_v43, 0.0  ;;  %v246_v26 = vsel %vm245_vm8, %v659_v46, %v244_v24  ;;  %vm247_vm10 = vcmp.eq.f32.partialorder %v659_v46, 0.0 }
 0x101   :  { %v242_v27 = vsel %vm240_vm9, %v241_v0, %v239_v23  ;;  %v249_v28 = vsel %vm247_vm10, %v248_v25, %v246_v26  ;;  %s524_s23 = scalar_lea.vmem %s673_s12, 64  ;;  %p529_p9 = scmp.lt.s32.totalorder %s673_s12, %s673_s12 }
 0x102   :  { %p525_p8 = scmp.ne.s32.totalorder %s673_s12, %s524_s23  ;;  %p530_p10 = scmp.lt.s32.totalorder %s524_s23, %s524_s23 }
 0x104   :  { %p531_p11 = por %p530_p10, %p529_p9 }
 0x106   :  { %p532_p12 = pnand %p531_p11, %p525_p8 }
 0x108   :  { %535 = shalt.err (!%p532_p12)
}
 0x109   :  { %s536_s25 = scalar_lea.hbm %s740_s6, 64 }
 0x10a   :  { %p537_p13 = scmp.ne.s32.totalorder %s740_s6, %s536_s25  ;;  %p540_p0 = scmp.lt.u32.totalorder %s536_s25, %s740_s6 }
 0x10c   :  { %p542_p1 = pnand %p540_p0, %p537_p13 }
 0x10e   :  { %545 = shalt.err (!%p542_p1)
}
 0x10f   :  { %379 = dma.vmem_to_hbm [thread:$0]  %s673_s12, 64, %s740_s6, [#allocation5]   ;;  %v424_v29 = vpack.c.bf16 %v249_v28, %v242_v27  ;;  %v499_v30 = vpop.eup %498  ;;  %vm252_vm11 = vcmp.eq.f32.partialorder %v662_v4, inf  ;;  %v255_v35 = vand.u32 2147483648, %v662_v4  ;;  %vm259_vm12 = vcmp.eq.f32.partialorder %v665_v9, inf }
 0x110   :  { %v251_v31 = vmul.f32 %v499_v30, %v662_v4  ;;  %v501_v32 = vpop.eup %500  ;;  %v262_v36 = vand.u32 2147483648, %v665_v9  ;;  %s576_s7 = smov [#allocation2]   ;;  %vm254_vm13 = vcmp.eq.f32.partialorder %v662_v4, 0.0  ;;  %vm261_vm14 = vcmp.eq.f32.partialorder %v665_v9, 0.0 }
 0x111   :  { %431 = vst [vmem:[#allocation2 + $0x8] sm:$0xff] %v424_v29   ;;  %v258_v34 = vmul.f32 %v501_v32, %v665_v9  ;;  %s353_s6 = sshll.u32 %s576_s7, 4  ;;  %s354_s6 = int_to_ptr.vmem [resolvable:$true] %s353_s6 }
 0x112   :  { %v253_v33 = vsel %vm252_vm11, %v662_v4, %v251_v31  ;;  %s546_s8 = scalar_lea.vmem %s354_s6, 384  ;;  %p551_p3 = scmp.lt.s32.totalorder %s354_s6, %s354_s6 }
 0x113   :  { %v260_v37 = vsel %vm259_vm12, %v665_v9, %v258_v34  ;;  %v256_v38 = vsel %vm254_vm13, %v255_v35, %v253_v33  ;;  %p547_p2 = scmp.ne.s32.totalorder %s354_s6, %s546_s8  ;;  %p552_p4 = scmp.lt.s32.totalorder %s546_s8, %s546_s8 }
 0x114   :  { %v263_v39 = vsel %vm261_vm14, %v262_v36, %v260_v37 }
 0x115   :  { %v429_v40 = vpack.c.bf16 %v263_v39, %v256_v38  ;;  %p553_p5 = por %p552_p4, %p551_p3 }
 0x117   :  { %432 = vst [vmem:[#allocation2 + $0x10] sm:$0xff] %v429_v40   ;;  %p554_p6 = pnand %p553_p5, %p547_p2 }
 0x119   :  { %557 = shalt.err (!%p554_p6)
}
 0x11a   :  { %s558_s11 = scalar_lea.hbm %s738_s4, 384 }
 0x11b   :  { %p559_p7 = scmp.ne.s32.totalorder %s738_s4, %s558_s11  ;;  %p562_p8 = scmp.lt.u32.totalorder %s558_s11, %s738_s4 }
 0x11d   :  { %p564_p9 = pnand %p562_p8, %p559_p7 }
 0x11f   :  { %567 = shalt.err (!%p564_p9)
}
 0x120   :  { %s577_s13 = smov 64   ;;  %s578_s14 = smov 4  }
 0x121   :  { %359 = dma.vmem_to_hbm [thread:$0]  %s354_s6, 384, %s738_s4, [#allocation3], %s577_s13, %s577_s13, %s578_s14  }
 0x122   :  { %568 = dma.done.wait [#allocation3], 384  }
 0x123   :  { %569 = vsyncadd [#allocation3], 4294966912 }
 0x124   :  { %570 = dma.done.wait [#allocation5], 128  }
 0x125   :  { %571 = vsyncadd [#allocation5], 4294967168 }
 0x126   :  { %389 = vsyncpa [#allocation3], 1 }
 0x127   :  { %390 = vsyncpa [#allocation5], 1 }

// kernel: tpu_custom_call.1
= control target key start
LH: loop header
LB: loop body
LE: loop exit
PB: predicated region body
PF: predicated region fallthrough
CT: control target
= control target key end

     0   :  { %12 = vsyncpa [#allocation3], 0  ;;  %vm62_vm0 = vcmask 1043456   ;;  %v572_v1 = vmov 0.0   ;;  %vm573_vm1 = vmmov 0   ;;  %vm52_vm2 = vcmask 64512   ;;  %s734_s0 = inlined_call_operand.vmem [shape: f32[8,128], index: 0, kind: input, shape index: {}]   ;;  %s735_s1 = inlined_call_operand.vmem [shape: bf16[48,8], index: 1, kind: input, shape index: {}]   ;;  %s736_s2 = inlined_call_operand.vmem [shape: bf16[48,8], index: 2, kind: input, shape index: {}]   ;;  %s737_s3 = inlined_call_operand.vmem [shape: bf16[8,8], index: 3, kind: input, shape index: {}]   ;;  %s738_s4 = inlined_call_operand.hbm [shape: bf16[48,128], index: 4, kind: output, shape index: {0}]   ;;  %s739_s5 = inlined_call_operand.hbm [shape: bf16[8,128], index: 5, kind: output, shape index: {1}]   ;;  %s740_s6 = inlined_call_operand.hbm [shape: bf16[8,128], index: 6, kind: output, shape index: {2}]  }
   0x1   :  { %v617_v0 = vld [vmem:[%s734_s0] sm:$0xff]  ;;  %443 = vmatprep.subr.bf16.mxu0 %v572_v1  ;;  %457 = vmatprep.subr.bf16.mxu1 %v572_v1 }
   0x2   :  { %v24_v2 = vpack.c.bf16 %v617_v0, %v617_v0  ;;  %445 = vmatprep.mubr.msk.bf16.mxu0 %vm573_vm1, %v572_v1  ;;  %459 = vmatprep.mubr.msk.bf16.mxu1 %vm573_vm1, %v572_v1  ;;  %v484_v3 = vld [vmem:[%s735_s1] sm:$0xff]  }
   0x3   :  { %v485_v5 = vld [vmem:[%s736_s2] sm:$0xff]  }
   0x4   :  { %v64_v4 = vsel %vm62_vm0, %v24_v2, 0 }
   0x5   :  { %444 = vmatpush3.bf16.msra.mxu0 %v64_v4  ;;  %458 = vmatpush3.bf16.msra.mxu1 %v64_v4 }
   0x6   :  { %471 = vmatprep.subr.bf16.mxu0 %v572_v1 }
   0x8   :  { %446 = vmatmul.mubr.msk.bf16.vlgmr.msra.gmra.mrb[0].mxu0 %vm52_vm2, %v484_v3  ;;  %460 = vmatmul.mubr.msk.bf16.vlgmr.msra.gmra.mrb[0].mxu1 %vm52_vm2, %v485_v5 }
   0x9   :  { %13 = vsyncpa [#allocation5], 0  ;;  %449 = vmatprep.mubr.msk.bf16.mxu0 %vm573_vm1, %v572_v1  ;;  %463 = vmatprep.mubr.msk.bf16.mxu1 %vm573_vm1, %v572_v1  ;;  %v486_v6 = vld [vmem:[%s735_s1 + $0x8] sm:$0xff]   ;;  %v488_v8 = vld [vmem:[%s735_s1 + $0x10] sm:$0xff]   ;;  %s574_s1 = smov [#allocation4]  }
   0xa   :  { %472 = vmatpush3.bf16.msra.mxu0 %v64_v4  ;;  %v487_v7 = vld [vmem:[%s736_s2 + $0x8] sm:$0xff]   ;;  %v489_v9 = vld [vmem:[%s736_s2 + $0x10] sm:$0xff]   ;;  %v298_v10 = vld [vmem:[%s737_s3] sm:$0xf]  ;;  %s366_s2 = sshll.u32 %s574_s1, 4  ;;  %s575_s3 = smov [#allocation6]   ;;  %s367_s2 = int_to_ptr.vmem [resolvable:$true] %s366_s2 }
   0xb   :  { %s376_s12 = sshll.u32 %s575_s3, 4  ;;  %s502_s13 = scalar_lea.vmem %s367_s2, 64  ;;  %s673_s12 = int_to_ptr.vmem [resolvable:$true] %s376_s12 }
   0xc   :  { %p503_p0 = scmp.ne.s32.totalorder %s367_s2, %s502_s13  ;;  %p507_p1 = scmp.lt.s32.totalorder %s367_s2, %s367_s2 }
   0xd   :  { %p508_p2 = scmp.lt.s32.totalorder %s502_s13, %s502_s13 }
   0xf   :  { %p509_p3 = por %p508_p2, %p507_p1 }
  0x10   :  { %450 = vmatmul.mubr.msk.bf16.gmra.mrb[4].mxu0 %vm52_vm2, %v486_v6  ;;  %464 = vmatmul.mubr.msk.bf16.gmra.mrb[4].mxu1 %vm52_vm2, %v487_v7 }
  0x11   :  { %453 = vmatprep.mubr.msk.bf16.mxu0 %vm573_vm1, %v572_v1  ;;  %467 = vmatprep.mubr.msk.bf16.mxu1 %vm573_vm1, %v572_v1  ;;  %p510_p4 = pnand %p509_p3, %p503_p0 }
  0x18   :  { %454 = vmatmul.mubr.msk.bf16.gmra.mrb[8].mxu0 %vm52_vm2, %v488_v8  ;;  %468 = vmatmul.mubr.msk.bf16.gmra.mrb[8].mxu1 %vm52_vm2, %v489_v9 }
  0x19   :  { %473 = vmatprep.mubr.msk.bf16.mxu0 %vm573_vm1, %v572_v1 }
  0x20   :  { %474 = vmatmul.mubr.msk.bf16.vlgmr.msra.gmra.mrb[12].mxu0 %vm52_vm2, %v298_v10 }
  0xdb   :  { %v100_v11 = vpop.f32.mrb[0].mxu0  ;;  %v187_v12 = vpop.f32.mrb[0].mxu1 }
  0xdc   :  { %v101_v13 = vadd.f32 1e-06, %v100_v11  ;;  %v188_v14 = vadd.f32 1e-06, %v187_v12  ;;  %v447_v15 = vpop.f32.mrb[1].mxu0  ;;  %v461_v16 = vpop.f32.mrb[1].mxu1 }
  0xdd   :  { %v103_v17 = vpop.f32.mrb[2].mxu0  ;;  %v190_v18 = vpop.f32.mrb[2].mxu1 }
  0xde   :  { %v123_v19 = vmul.f32 %v101_v13, %v101_v13  ;;  %v210_v20 = vmul.f32 %v188_v14, %v188_v14  ;;  %v104_v21 = vadd.f32 1e-06, %v103_v17  ;;  %v191_v22 = vadd.f32 1e-06, %v190_v18  ;;  %v448_v23 = vpop.f32.mrb[3].mxu0  ;;  %v462_v24 = vpop.f32.mrb[3].mxu1 }
  0xe0   :  { %v216_v25 = vadd.f32 %v210_v20, %v123_v19  ;;  %v124_v26 = vmul.f32 %v104_v21, %v104_v21  ;;  %v211_v27 = vmul.f32 %v191_v22, %v191_v22 }
  0xe2   :  { %490 = vrsqrt.f32 %v216_v25  ;;  %v217_v28 = vadd.f32 %v211_v27, %v124_v26  ;;  %vm224_vm3 = vcmp.eq.f32.partialorder %v216_v25, inf  ;;  %v227_v2 = vand.u32 2147483648, %v216_v25 }
  0xe3   :  { %v108_v29 = vpop.f32.mrb[4].mxu0  ;;  %v195_v30 = vpop.f32.mrb[4].mxu1  ;;  %vm226_vm5 = vcmp.eq.f32.partialorder %v216_v25, 0.0 }
  0xe4   :  { %492 = vrsqrt.f32 %v217_v28  ;;  %v109_v31 = vadd.f32 1e-06, %v108_v29  ;;  %v196_v32 = vadd.f32 1e-06, %v195_v30  ;;  %v451_v33 = vpop.f32.mrb[5].mxu0  ;;  %v465_v34 = vpop.f32.mrb[5].mxu1 }
  0xe5   :  { %v111_v35 = vpop.f32.mrb[6].mxu0  ;;  %v198_v36 = vpop.f32.mrb[6].mxu1  ;;  %vm231_vm4 = vcmp.eq.f32.partialorder %v217_v28, inf  ;;  %v234_v7 = vand.u32 2147483648, %v217_v28  ;;  %vm233_vm6 = vcmp.eq.f32.partialorder %v217_v28, 0.0 }
  0xe6   :  { %v125_v37 = vmul.f32 %v109_v31, %v109_v31  ;;  %v212_v38 = vmul.f32 %v196_v32, %v196_v32  ;;  %v112_v39 = vadd.f32 1e-06, %v111_v35  ;;  %v199_v40 = vadd.f32 1e-06, %v198_v36  ;;  %v452_v41 = vpop.f32.mrb[7].mxu0  ;;  %v466_v42 = vpop.f32.mrb[7].mxu1 }
  0xe8   :  { %v656_v43 = vadd.f32 %v212_v38, %v125_v37  ;;  %v126_v44 = vmul.f32 %v112_v39, %v112_v39  ;;  %v213_v45 = vmul.f32 %v199_v40, %v199_v40 }
  0xea   :  { %494 = vrsqrt.f32 %v656_v43  ;;  %v659_v46 = vadd.f32 %v213_v45, %v126_v44  ;;  %vm238_vm7 = vcmp.eq.f32.partialorder %v656_v43, inf }
  0xeb   :  { %v116_v47 = vpop.f32.mrb[8].mxu0  ;;  %v203_v48 = vpop.f32.mrb[8].mxu1 }
  0xec   :  { %v491_v49 = vpop.eup %490  ;;  %496 = vrsqrt.f32 %v659_v46  ;;  %v117_v50 = vadd.f32 1e-06, %v116_v47  ;;  %v204_v51 = vadd.f32 1e-06, %v203_v48  ;;  %v455_v52 = vpop.f32.mrb[9].mxu0  ;;  %vm245_vm8 = vcmp.eq.f32.partialorder %v659_v46, inf }
  0xed   :  { %v469_v53 = vpop.f32.mrb[9].mxu1  ;;  %v119_v54 = vpop.f32.mrb[10].mxu0  ;;  %v223_v56 = vmul.f32 %v491_v49, %v216_v25 }
  0xee   :  { %v206_v55 = vpop.f32.mrb[10].mxu1  ;;  %v493_v57 = vpop.eup %492  ;;  %v127_v58 = vmul.f32 %v117_v50, %v117_v50  ;;  %v214_v59 = vmul.f32 %v204_v51, %v204_v51  ;;  %v120_v60 = vadd.f32 1e-06, %v119_v54 }
  0xef   :  { %v207_v61 = vadd.f32 1e-06, %v206_v55  ;;  %v456_v62 = vpop.f32.mrb[11].mxu0  ;;  %v470_v63 = vpop.f32.mrb[11].mxu1  ;;  %v225_v1 = vsel %vm224_vm3, %v216_v25, %v223_v56  ;;  %v230_v3 = vmul.f32 %v493_v57, %v217_v28  ;;  %v248_v25 = vand.u32 2147483648, %v659_v46 }
  0xf0   :  { %v662_v4 = vadd.f32 %v214_v59, %v127_v58  ;;  %v128_v5 = vmul.f32 %v120_v60, %v120_v60  ;;  %v228_v10 = vsel %vm226_vm5, %v227_v2, %v225_v1 }
  0xf1   :  { %v215_v6 = vmul.f32 %v207_v61, %v207_v61  ;;  %v232_v8 = vsel %vm231_vm4, %v217_v28, %v230_v3 }
  0xf2   :  { %498 = vrsqrt.f32 %v662_v4  ;;  %v235_v11 = vsel %vm233_vm6, %v234_v7, %v232_v8 }
  0xf3   :  { %v665_v9 = vadd.f32 %v215_v6, %v128_v5  ;;  %v336_v12 = vpop.f32.mrb[12].mxu0  ;;  %v419_v13 = vpack.c.bf16 %v235_v11, %v228_v10 }
  0xf4   :  { %v495_v14 = vpop.eup %494  ;;  %v342_v15 = vpack.c.bf16 %v336_v12, %v336_v12  ;;  %v345_v16 = vsub.f32 %v617_v0, %v336_v12  ;;  %v475_v17 = vpop.f32.mrb[13].mxu0  ;;  %v241_v0 = vand.u32 2147483648, %v656_v43 }
  0xf5   :  { %500 = vrsqrt.f32 %v665_v9  ;;  %v339_v18 = vpop.f32.mrb[14].mxu0  ;;  %v237_v19 = vmul.f32 %v495_v14, %v656_v43  ;;  %420 = vst [vmem:[#allocation2] sm:$0xff] %v419_v13  }
  0xf6   :  { %v497_v20 = vpop.eup %496  ;;  %343 = vst [vmem:[#allocation6] sm:$0xf] %v342_v15  ;;  %v476_v21 = vpop.f32.mrb[15].mxu0  ;;  %v346_v22 = vpack.c.bf16 %v345_v16, %v345_v16 }
  0xf7   :  { %v239_v23 = vsel %vm238_vm7, %v656_v43, %v237_v19  ;;  %v244_v24 = vmul.f32 %v497_v20, %v659_v46 }
  0xf8   :  { %347 = vst [vmem:[#allocation4] sm:$0xf] %v346_v22 }
  0xf9   :  { %513 = shalt.err (!%p510_p4)
}
  0xfa   :  { %s514_s16 = scalar_lea.hbm %s739_s5, 64 }
  0xfb   :  { %p515_p5 = scmp.ne.s32.totalorder %s739_s5, %s514_s16  ;;  %p518_p6 = scmp.lt.u32.totalorder %s514_s16, %s739_s5 }
  0xfd   :  { %p520_p7 = pnand %p518_p6, %p515_p5 }
  0xff   :  { %523 = shalt.err (!%p520_p7)
}
 0x100   :  { %369 = dma.vmem_to_hbm [thread:$0]  %s367_s2, 64, %s739_s5, [#allocation5]   ;;  %vm240_vm9 = vcmp.eq.f32.partialorder %v656_v43, 0.0  ;;  %v246_v26 = vsel %vm245_vm8, %v659_v46, %v244_v24  ;;  %vm247_vm10 = vcmp.eq.f32.partialorder %v659_v46, 0.0 }
 0x101   :  { %v242_v27 = vsel %vm240_vm9, %v241_v0, %v239_v23  ;;  %v249_v28 = vsel %vm247_vm10, %v248_v25, %v246_v26  ;;  %s524_s23 = scalar_lea.vmem %s673_s12, 64  ;;  %p529_p9 = scmp.lt.s32.totalorder %s673_s12, %s673_s12 }
 0x102   :  { %p525_p8 = scmp.ne.s32.totalorder %s673_s12, %s524_s23  ;;  %p530_p10 = scmp.lt.s32.totalorder %s524_s23, %s524_s23 }
 0x104   :  { %p531_p11 = por %p530_p10, %p529_p9 }
 0x106   :  { %p532_p12 = pnand %p531_p11, %p525_p8 }
 0x108   :  { %535 = shalt.err (!%p532_p12)
}
 0x109   :  { %s536_s25 = scalar_lea.hbm %s740_s6, 64 }
 0x10a   :  { %p537_p13 = scmp.ne.s32.totalorder %s740_s6, %s536_s25  ;;  %p540_p0 = scmp.lt.u32.totalorder %s536_s25, %s740_s6 }
 0x10c   :  { %p542_p1 = pnand %p540_p0, %p537_p13 }
 0x10e   :  { %545 = shalt.err (!%p542_p1)
}
 0x10f   :  { %379 = dma.vmem_to_hbm [thread:$0]  %s673_s12, 64, %s740_s6, [#allocation5]   ;;  %v424_v29 = vpack.c.bf16 %v249_v28, %v242_v27  ;;  %v499_v30 = vpop.eup %498  ;;  %vm252_vm11 = vcmp.eq.f32.partialorder %v662_v4, inf  ;;  %v255_v35 = vand.u32 2147483648, %v662_v4  ;;  %vm259_vm12 = vcmp.eq.f32.partialorder %v665_v9, inf }
 0x110   :  { %v251_v31 = vmul.f32 %v499_v30, %v662_v4  ;;  %v501_v32 = vpop.eup %500  ;;  %v262_v36 = vand.u32 2147483648, %v665_v9  ;;  %s576_s7 = smov [#allocation2]   ;;  %vm254_vm13 = vcmp.eq.f32.partialorder %v662_v4, 0.0  ;;  %vm261_vm14 = vcmp.eq.f32.partialorder %v665_v9, 0.0 }
 0x111   :  { %431 = vst [vmem:[#allocation2 + $0x8] sm:$0xff] %v424_v29   ;;  %v258_v34 = vmul.f32 %v501_v32, %v665_v9  ;;  %s353_s6 = sshll.u32 %s576_s7, 4  ;;  %s354_s6 = int_to_ptr.vmem [resolvable:$true] %s353_s6 }
 0x112   :  { %v253_v33 = vsel %vm252_vm11, %v662_v4, %v251_v31  ;;  %s546_s8 = scalar_lea.vmem %s354_s6, 384  ;;  %p551_p3 = scmp.lt.s32.totalorder %s354_s6, %s354_s6 }
 0x113   :  { %v260_v37 = vsel %vm259_vm12, %v665_v9, %v258_v34  ;;  %v256_v38 = vsel %vm254_vm13, %v255_v35, %v253_v33  ;;  %p547_p2 = scmp.ne.s32.totalorder %s354_s6, %s546_s8  ;;  %p552_p4 = scmp.lt.s32.totalorder %s546_s8, %s546_s8 }
 0x114   :  { %v263_v39 = vsel %vm261_vm14, %v262_v36, %v260_v37 }
 0x115   :  { %v429_v40 = vpack.c.bf16 %v263_v39, %v256_v38  ;;  %p553_p5 = por %p552_p4, %p551_p3 }
 0x117   :  { %432 = vst [vmem:[#allocation2 + $0x10] sm:$0xff] %v429_v40   ;;  %p554_p6 = pnand %p553_p5, %p547_p2 }
 0x119   :  { %557 = shalt.err (!%p554_p6)
}
 0x11a   :  { %s558_s11 = scalar_lea.hbm %s738_s4, 384 }
 0x11b   :  { %p559_p7 = scmp.ne.s32.totalorder %s738_s4, %s558_s11  ;;  %p562_p8 = scmp.lt.u32.totalorder %s558_s11, %s738_s4 }
 0x11d   :  { %p564_p9 = pnand %p562_p8, %p559_p7 }
 0x11f   :  { %567 = shalt.err (!%p564_p9)
}
 0x120   :  { %s577_s13 = smov 64   ;;  %s578_s14 = smov 4  }
 0x121   :  { %359 = dma.vmem_to_hbm [thread:$0]  %s354_s6, 384, %s738_s4, [#allocation3], %s577_s13, %s577_s13, %s578_s14  }
 0x122   :  { %568 = dma.done.wait [#allocation3], 384  }
 0x123   :  { %569 = vsyncadd [#allocation3], 4294966912 }
 0x124   :  { %570 = dma.done.wait [#allocation5], 128  }
 0x125   :  { %571 = vsyncadd [#allocation5], 4294967168 }
 0x126   :  { %389 = vsyncpa [#allocation3], 1 }
 0x127   :  { %390 = vsyncpa [#allocation5], 1 }

</bundles_post_ra>
